<compile_context>
chip_gen: v5e
topology: v5e:2x2
jax: 0.10.0
libtpu: 0.0.40
codegen_flags: <defaults>
</compile_context>

<pallas_src>
import jax
import jax.numpy as jnp
from jax import lax
from jax.experimental import pallas as pl
from jax.experimental.pallas import tpu as pltpu


def simple_attn_kernel(num_ref, x_ref, w_ref, bias_ref, o_ref):
    """One grid step handles TB batch rows.

    num_ref  : VMEM (TB, 1) or (TB, 1, 1) int32 -- valid sequence lengths
    x_ref    : VMEM (TB, S, D)                  -- input tile
    w_ref    : VMEM (1, D)                      -- Linear weight (out_features=1)
    bias_ref : SMEM (1, 1) f32                  -- Linear bias (scalar)
    o_ref    : VMEM (TB, D) or (TB, 1, D)       -- output tile
    """
    x = x_ref[...]                                       # (TB, S, D)
    TB, S, D = x.shape
    bias = bias_ref[0, 0]

    # scores[b, 0, s] = <x[b, s, :], w> + bias  -- batched MXU matvec, f32 accum.
    w_b = jnp.broadcast_to(w_ref[...].reshape(1, 1, D), (TB, 1, D)).astype(x.dtype)
    scores = jnp.einsum("bqd,bsd->bqs", w_b, x,
                        preferred_element_type=jnp.float32) + bias   # (TB, 1, S)

    # Mask on the scores instead of on the (S, D) data: in the reference a masked
    # (zeroed) row gives score == bias and contributes 0 to the output sum.
    n = num_ref[...].reshape(TB, 1, 1)
    seq_idx = lax.broadcasted_iota(jnp.int32, (TB, 1, S), 2)
    mask = seq_idx < n                                               # (TB, 1, S)
    scores = jnp.where(mask, scores, bias)

    # Softmax over the sequence (lane) axis, in f32.
    m = jnp.max(scores, axis=-1, keepdims=True)
    e = jnp.exp(scores - m)
    alpha = e / jnp.sum(e, axis=-1, keepdims=True)                   # (TB, 1, S)
    alpha = jnp.where(mask, alpha, 0.0)   # masked rows of x are zero in the ref

    # Weighted sum over S as a batched MXU matmul, f32 accumulation.
    out = jnp.einsum("bqs,bsd->bqd", alpha.astype(x.dtype), x,
                     preferred_element_type=jnp.float32)             # (TB, 1, D)

    if len(o_ref.shape) == 2:            # lane-dense (TB, D) output block
        o_ref[...] = out[:, 0, :].astype(o_ref.dtype)
    else:                                # (TB, 1, D) fallback (huge-row regime)
        o_ref[...] = out.astype(o_ref.dtype)


def _cdiv(a, b):
    return -(-a // b)


def _vmem_limit_bytes():
    """Scoped VMEM limit: ~75% of physical, capped (v7x ~48 MiB, v5e/v6e ~96 MiB)."""
    phys = 64 * 1024 * 1024  # conservative default (v7x per-TensorCore)
    try:
        phys = int(pltpu.get_tpu_info().vmem_capacity_bytes)
    except Exception:
        pass
    return int(min(phys * 3 // 4, 100 * 1024 * 1024))


def _two_tensorcores():
    """Best-effort detection of chips with 2 TensorCores sharing HBM (v7x, v4)."""
    try:
        kind = jax.devices()[0].device_kind.lower()
        return ("v7" in kind) or ("v4" in kind)
    except Exception:
        return False


def _tiling(batch, row_bytes, budget_bytes, two_cores):
    """Rows per grid step and step count; TB is a multiple of 8 or == batch."""
    cap = max(1, budget_bytes // (2 * row_bytes))   # rows fitting a double-buffered window
    if cap >= batch:
        tb = batch
    elif cap >= 8:
        tb = (cap // 8) * 8          # keep 2-D (TB, D)/(TB, 1) blocks tile-aligned
    else:
        tb = cap                     # huge rows: 3-D fallback output layout
    steps = _cdiv(batch, tb)
    # v7x megacore: give each TensorCore >= 2 pipelined steps once there is
    # enough data to split; pure overhead on single-TC chips, so gated.
    if two_cores and steps < 4 and batch >= 32 and batch * row_bytes >= (4 << 20):
        tb = min(batch, max(8, (_cdiv(batch, 4) // 8) * 8))
        steps = _cdiv(batch, tb)
    return int(tb), int(steps)


def simple_attn(x, weight, bias, input_num=None, *, rows_per_step=None):
    """x: (B, S, D), weight: (1, D), bias: (1,), input_num: (B,) ints or None."""
    B, S, D = x.shape
    if input_num is None:
        input_num = jnp.full((B,), S, dtype=jnp.int32)
    input_num = input_num.astype(jnp.int32)

    row_bytes = S * D * jnp.dtype(x.dtype).itemsize
    vmem_limit = _vmem_limit_bytes()
    budget = int(vmem_limit * 0.65)            # double-buffered x window budget
    tb, steps = _tiling(B, row_bytes, budget, _two_tensorcores())
    if rows_per_step is not None:              # test/tuning override
        tb = int(max(1, min(rows_per_step, B)))
        steps = _cdiv(B, tb)
    # TODO(synk): for very long sequences (2*row_bytes approaching the VMEM
    # limit) add a second grid axis over S with an online-softmax accumulator
    # instead of shrinking the batch tile.

    use_2d = (tb == B) or (tb % 8 == 0)

    w2 = weight.reshape(1, D).astype(x.dtype)
    bias2 = jnp.asarray(bias, dtype=jnp.float32).reshape(1, 1)

    if use_2d:
        num = input_num.reshape(B, 1)
        num_spec = pl.BlockSpec((tb, 1), lambda i: (i, 0))
        out_shape = jax.ShapeDtypeStruct((B, D), x.dtype)
        out_spec = pl.BlockSpec((tb, D), lambda i: (i, 0))
    else:
        num = input_num.reshape(B, 1, 1)
        num_spec = pl.BlockSpec((tb, 1, 1), lambda i: (i, 0, 0))
        out_shape = jax.ShapeDtypeStruct((B, 1, D), x.dtype)
        out_spec = pl.BlockSpec((tb, 1, D), lambda i: (i, 0, 0))

    out = pl.pallas_call(
        simple_attn_kernel,
        out_shape=out_shape,
        grid_spec=pltpu.PrefetchScalarGridSpec(
            num_scalar_prefetch=0,
            grid=(steps,),
            in_specs=[
                num_spec,                                             # lengths
                pl.BlockSpec((tb, S, D), lambda i: (i, 0, 0)),        # x tile
                pl.BlockSpec((1, D), lambda i: (0, 0)),               # weight (resident)
                pl.BlockSpec(memory_space=pltpu.MemorySpace.SMEM),    # bias scalar
            ],
            out_specs=out_spec,
        ),
        compiler_params=pltpu.CompilerParams(
            dimension_semantics=("parallel",),   # batch steps shard across cores
            vmem_limit_bytes=vmem_limit,
        ),
    )(num, x, w2, bias2)
    if not use_2d:
        out = out[:, 0, :]
    return out


def simple_attn_ref(x, weight, bias, input_num=None):
    """Pure-JAX reference mirroring the PyTorch forward exactly."""
    B, S, D = x.shape
    if input_num is not None:
        masks = (jnp.arange(S)[None, :] < input_num[:, None]).astype(x.dtype)
        x = x * masks[..., None]
    scores = jnp.einsum("bsd,od->bso", x, weight) + bias    # (B, S, 1)
    alpha = jax.nn.softmax(scores, axis=1)                  # softmax over seq
    return jnp.einsum("bso,bsd->bod", alpha, x)[:, 0, :]    # == (alpha * x).sum(1)


if __name__ == "__main__":
    key = jax.random.PRNGKey(0)
    k1, k2, k3, k4, k5 = jax.random.split(key, 5)

    # Tolerance leaves headroom for the bf16 MXU passes that the platform's
    # default precision may use for f32 matmuls; real semantic bugs are O(0.1+).
    ATOL = RTOL = 5e-3

    # --- small config matching the module's (batch, seq, dim) convention ---
    B, S, D = 2, 8, 32
    x = jax.random.normal(k1, (B, S, D), dtype=jnp.float32)
    weight = 0.1 * jax.random.normal(k2, (1, D), dtype=jnp.float32)  # normal_(w,0,0.1)
    bias = jnp.zeros((1,), dtype=jnp.float32)                        # constant_(b,0)
    input_num = jnp.array([5, 8], dtype=jnp.int32)

    out = jax.block_until_ready(simple_attn(x, weight, bias, input_num))
    ref = simple_attn_ref(x, weight, bias, input_num)
    assert out.shape == (B, D)
    assert jnp.allclose(out, ref, atol=ATOL, rtol=RTOL), \
        float(jnp.max(jnp.abs(out - ref)))

    # Unmasked path (input_num=None)
    out2 = jax.block_until_ready(simple_attn(x, weight, bias, None))
    ref2 = simple_attn_ref(x, weight, bias, None)
    assert jnp.allclose(out2, ref2, atol=ATOL, rtol=RTOL)

    # --- larger config: TB == B, single step, no padding, 2-D output ---
    B2, S2, D2 = 11, 128, 256
    x2 = jax.random.normal(k3, (B2, S2, D2), dtype=jnp.float32)
    w2 = 0.1 * jax.random.normal(k4, (1, D2), dtype=jnp.float32)
    b2 = jnp.zeros((1,), dtype=jnp.float32)
    n2 = jax.random.randint(k5, (B2,), 0, S2 + 1, dtype=jnp.int32)

    out3 = jax.block_until_ready(simple_attn(x2, w2, b2, n2))
    ref3 = simple_attn_ref(x2, w2, b2, n2)
    assert out3.shape == (B2, D2)
    assert jnp.allclose(out3, ref3, atol=ATOL, rtol=RTOL), \
        float(jnp.max(jnp.abs(out3 - ref3)))

    # --- forced multi-step path: TB=8, 3 steps, partial (unpadded) last block ---
    B3, S3, D3 = 20, 16, 128
    x3 = jax.random.normal(k3, (B3, S3, D3), dtype=jnp.float32)
    w3 = 0.1 * jax.random.normal(k4, (1, D3), dtype=jnp.float32)
    n3 = jax.random.randint(k5, (B3,), 0, S3 + 1, dtype=jnp.int32)

    out4 = jax.block_until_ready(simple_attn(x3, w3, b2, n3, rows_per_step=8))
    ref4 = simple_attn_ref(x3, w3, b2, n3)
    assert out4.shape == (B3, D3)
    assert jnp.allclose(out4, ref4, atol=ATOL, rtol=RTOL), \
        float(jnp.max(jnp.abs(out4 - ref4)))

    # --- forced tiny tile (TB=2 < 8): exercises the 3-D fallback output layout ---
    out5 = jax.block_until_ready(simple_attn(x3[:5], w3, b2, n3[:5], rows_per_step=2))
    ref5 = simple_attn_ref(x3[:5], w3, b2, n3[:5])
    assert jnp.allclose(out5, ref5, atol=ATOL, rtol=RTOL), \
        float(jnp.max(jnp.abs(out5 - ref5)))

    print("KERNEL_OK")
</pallas_src>

<mosaic_0001>
module attributes {stable_mosaic.version = 11 : i64} {
  func.func @simple_attn_kernel(%arg0: i32, %arg1: memref<2x1xi32, #tpu.memory_space<vmem>>, %arg2: memref<2x8x32xf32, #tpu.memory_space<vmem>>, %arg3: memref<1x32xf32, #tpu.memory_space<vmem>>, %arg4: memref<1x1xf32, #tpu.memory_space<smem>>, %arg5: memref<2x32xf32, #tpu.memory_space<vmem>>) attributes {dimension_semantics = [#tpu.dimension_semantics<parallel>], iteration_bounds = array<i64: 1>, scalar_prefetch = 0 : i64, scratch_operands = 0 : i64, tpu.core_type = #tpu.core_type<tc>, window_params = [{transform_indices = @transform_0, window_bounds = array<i64: 2, 1>}, {transform_indices = @transform_1, window_bounds = array<i64: 2, 8, 32>}, {pipeline_mode = #tpu.pipeline_mode<synchronous>, transform_indices = @transform_2, window_bounds = array<i64: 1, 32>}, {transform_indices = @transform_3, window_bounds = array<i64: 1, 1>}, {transform_indices = @transform_4, window_bounds = array<i64: 2, 32>}]} {
    %c0 = arith.constant 0 : index
    %c0_0 = arith.constant 0 : index
    %c0_1 = arith.constant 0 : index
    %0 = vector.load %arg2[%c0, %c0_0, %c0_1] : memref<2x8x32xf32, #tpu.memory_space<vmem>>, vector<2x8x32xf32>
    %c0_2 = arith.constant 0 : index
    %c0_3 = arith.constant 0 : index
    %1 = memref.load %arg4[%c0_2, %c0_3] : memref<1x1xf32, #tpu.memory_space<smem>>
    %c0_4 = arith.constant 0 : index
    %c0_5 = arith.constant 0 : index
    %2 = vector.load %arg3[%c0_4, %c0_5] : memref<1x32xf32, #tpu.memory_space<vmem>>, vector<1x32xf32>
    %3 = vector.shape_cast %2 : vector<1x32xf32> to vector<1x1x32xf32>
    %4 = vector.shape_cast %3 : vector<1x1x32xf32> to vector<1x1x32xf32>
    %5 = vector.broadcast %4 : vector<1x1x32xf32> to vector<2x1x32xf32>
    "tpu.trace_start"() <{level = 10 : i32, message = "bqd,bsd->bqs"}> : () -> ()
    %cst = arith.constant dense<0.000000e+00> : vector<2x1x8xf32>
    %6 = tpu.matmul %5, %0, %cst {dimension_numbers = #tpu.dot_dimension_numbers<[2], [2], [1], [1], [0, 0, 0, 1, 1, 1], [0], [0]>} : vector<2x1x32xf32>, vector<2x8x32xf32>, vector<2x1x8xf32> -> vector<2x1x8xf32>
    "tpu.trace_stop"() : () -> ()
    %7 = vector.broadcast %1 : f32 to vector<2x1x8xf32>
    %8 = arith.addf %6, %7 : vector<2x1x8xf32>
    %c0_6 = arith.constant 0 : index
    %c0_7 = arith.constant 0 : index
    %9 = vector.load %arg1[%c0_6, %c0_7] : memref<2x1xi32, #tpu.memory_space<vmem>>, vector<2x1xi32>
    %10 = vector.shape_cast %9 : vector<2x1xi32> to vector<2x1x1xi32>
    %11 = tpu.iota {dimensions = array<i32: 2>} : vector<2x1x8xi32>
    %12 = vector.broadcast %10 : vector<2x1x1xi32> to vector<2x1x8xi32>
    %13 = arith.cmpi slt, %11, %12 : vector<2x1x8xi32>
    %14 = vector.broadcast %1 : f32 to vector<2x1x8xf32>
    %15 = arith.select %13, %8, %14 : vector<2x1x8xi1>, vector<2x1x8xf32>
    %cst_8 = arith.constant dense<0xFF800000> : vector<2x1xf32>
    %16 = vector.multi_reduction <maximumf>, %15, %cst_8 [2] : vector<2x1x8xf32> to vector<2x1xf32>
    %17 = vector.shape_cast %16 : vector<2x1xf32> to vector<2x1x1xf32>
    %18 = vector.broadcast %17 : vector<2x1x1xf32> to vector<2x1x8xf32>
    %19 = arith.subf %15, %18 : vector<2x1x8xf32>
    %20 = math.exp %19 : vector<2x1x8xf32>
    %cst_9 = arith.constant dense<0.000000e+00> : vector<2x1xf32>
    %21 = vector.multi_reduction <add>, %20, %cst_9 [2] : vector<2x1x8xf32> to vector<2x1xf32>
    %22 = vector.shape_cast %21 : vector<2x1xf32> to vector<2x1x1xf32>
    %23 = vector.broadcast %22 : vector<2x1x1xf32> to vector<2x1x8xf32>
    %24 = arith.divf %20, %23 : vector<2x1x8xf32>
    %cst_10 = arith.constant 0.000000e+00 : f32
    %25 = vector.broadcast %cst_10 : f32 to vector<2x1x8xf32>
    %26 = arith.select %13, %24, %25 : vector<2x1x8xi1>, vector<2x1x8xf32>
    "tpu.trace_start"() <{level = 10 : i32, message = "bqs,bsd->bqd"}> : () -> ()
    %cst_11 = arith.constant dense<0.000000e+00> : vector<2x1x32xf32>
    %27 = tpu.matmul %26, %0, %cst_11 {dimension_numbers = #tpu.dot_dimension_numbers<[2], [1], [1], [2], [0, 0, 0, 1, 1, 2], [0], [0]>} : vector<2x1x8xf32>, vector<2x8x32xf32>, vector<2x1x32xf32> -> vector<2x1x32xf32>
    "tpu.trace_stop"() : () -> ()
    %28 = vector.shape_cast %27 : vector<2x1x32xf32> to vector<2x32xf32>
    %c0_12 = arith.constant 0 : index
    %c0_13 = arith.constant 0 : index
    %29 = vector.load %arg5[%c0_12, %c0_13] : memref<2x32xf32, #tpu.memory_space<vmem>>, vector<2x32xf32>
    tpu.vector_store %arg5[%c0_12, %c0_13], %28 {strides = array<i32>} : memref<2x32xf32, #tpu.memory_space<vmem>>, vector<2x32xf32>,
    return
  }
  func.func @transform_0(%arg0: i32) -> (i32, i32) {
    %c0_i32 = arith.constant 0 : i32
    %c0_i32_0 = arith.constant 0 : i32
    return %arg0, %c0_i32 : i32, i32
  }
  func.func @transform_1(%arg0: i32) -> (i32, i32, i32) {
    %c0_i32 = arith.constant 0 : i32
    %c0_i32_0 = arith.constant 0 : i32
    %c0_i32_1 = arith.constant 0 : i32
    return %arg0, %c0_i32, %c0_i32_0 : i32, i32, i32
  }
  func.func @transform_2(%arg0: i32) -> (i32, i32) {
    %c0_i32 = arith.constant 0 : i32
    %c0_i32_0 = arith.constant 0 : i32
    %c0_i32_1 = arith.constant 0 : i32
    return %c0_i32, %c0_i32_0 : i32, i32
  }
  func.func @transform_3(%arg0: i32) -> (i32, i32) {
    %c0_i32 = arith.constant 0 : i32
    %c0_i32_0 = arith.constant 0 : i32
    %c0_i32_1 = arith.constant 0 : i32
    return %c0_i32, %c0_i32_0 : i32, i32
  }
  func.func @transform_4(%arg0: i32) -> (i32, i32) {
    %c0_i32 = arith.constant 0 : i32
    %c0_i32_0 = arith.constant 0 : i32
    return %arg0, %c0_i32 : i32, i32
  }
}

</mosaic_0001>

<bundles_post_ra>
// kernel: tpu_custom_call.1
= control target key start
LH: loop header
LB: loop body
LE: loop exit
PB: predicated region body
PF: predicated region fallthrough
CT: control target
= control target key end

     0   :  { %10 = vsyncpa [#allocation4], 0  ;;  %s368_s0 = inlined_call_operand.vmem [shape: s32[2,1], index: 0, kind: input, shape index: {}]   ;;  %s369_s1 = inlined_call_operand.hbm [shape: f32[2,8,32], index: 1, kind: input, shape index: {}]   ;;  %s370_s2 = inlined_call_operand.vmem [shape: f32[1,32], index: 2, kind: input, shape index: {}]   ;;  %s371_s3 = inlined_call_operand.<no memory space> [shape: f32[1,1], index: 3, kind: input, shape index: {}]   ;;  %s372_s4 = inlined_call_operand.hbm [shape: f32[2,32], index: 4, kind: output, shape index: {}]  }
   0x1   :  { %11 = vsyncpa [#allocation5], 0  ;;  %s18_s17 = sshll.u32 %s369_s1, 4  ;;  %s301_s18 = smov [#allocation3]   ;;  %s19_s17 = int_to_ptr.hbm [resolvable:$true] %s18_s17 }
   0x2   :  { %s20_s19 = sshll.u32 %s301_s18, 4  ;;  %s302_s20 = smov 128   ;;  %s21_s19 = int_to_ptr.vmem [resolvable:$true] %s20_s19 }
   0x3   :  { %s303_s21 = smov 8  }
   0x4   :  { %26 = dma.hbm_to_vmem [thread:$0]  %s19_s17, 256, %s21_s19, [#allocation4], %s302_s20, %s302_s20, %s303_s21  }
   0x5   :  { %297 = dma.done.wait [#allocation4], 256  }
   0x6   :  { %298 = vsyncadd [#allocation4], 4294967040  ;;  %v304_v0 = vmov 0   ;;  %vm40_vm0 = vcmask 261120   ;;  %v35_v1 = vld [vmem:[#allocation3] sm:$0xff]  ;;  %v36_v2 = vld [vmem:[#allocation3 + $0x8] sm:$0xff]  ;;  %v92_v7 = vlaneseq  ;;  %v39_v10 = vstv %s371_s3 }
   0x7   :  { %240 = vset.pattern.permute.xlu0 %v304_v0  ;;  %229 = vmatpush.xpose.msk.msra.mxu0 %vm40_vm0, %v35_v1  ;;  %v38_v3 = vld [vmem:[%s370_s2] sm:$0x1]  ;;  %vm106_vm2 = vcmask 57344   ;;  %vm157_vm8 = vcmask 64512   ;;  %s219_s28 = sshll.u32 %s372_s4, 4  ;;  %vm207_vm13 = vcmask 1041409   ;;  %s220_s28 = int_to_ptr.hbm [resolvable:$true] %s219_s28 }
   0x8   :  { %231 = vmatpush.xpose.msk.msra.mxu1 %vm40_vm0, %v36_v2  ;;  %v90_v4 = vld [vmem:[%s368_s0] sm:$0x3]  ;;  %199 = vmatpush.msra.mxu3 %v36_v2  ;;  %v93_v8 = vand.u32 127, %v92_v7  ;;  %s305_s0 = smov [#allocation6]   ;;  %vm210_vm14 = vcmask 254976  }
   0x9   :  { %v91_v5 = vrot.slane %v90_v4, 1  ;;  %176 = vmatpush.msra.mxu2 %v35_v1  ;;  %s217_s2 = sshll.u32 %s305_s0, 4  ;;  %s218_s2 = int_to_ptr.vmem [resolvable:$true] %s217_s2 }
   0xa   :  { %230 = vmatmul.msk.f32.vlgmr.msra.gmra.mxu0 %vm40_vm0, %v38_v3 }
   0xb   :  { %232 = vmatmul.msk.f32.vlgmr.msra.gmra.mxu1 %vm40_vm0, %v38_v3  ;;  %99 = vperm.xlu0 %240, %v91_v5  }
  0x13   :  { %95 = vperm.xlu0 %240, %v90_v4  }
  0x7d   :  { %v100_v6 = vpop.permute.xlu0 %99 }
  0x7e   :  { %v101_v9 = vperm.slane %v100_v6, 0 }
  0x80   :  { %vm343_vm1 = vcmp.lt.s32.totalorder %v93_v8, %v101_v9 }
  0x85   :  { %v96_v11 = vpop.permute.xlu0 %95 }
  0x86   :  { %v97_v15 = vperm.slane %v96_v11, 0 }
  0x87   :  { %v64_v16 = vpop.f32.mrf.mxu0 }
  0x88   :  { %v87_v13 = vpop.f32.mrf.mxu1  ;;  %v65_v19 = vadd.f32 %v64_v16, %v39_v10  ;;  %vm350_vm3 = vcmp.lt.s32.totalorder %v93_v8, %v97_v15 }
  0x89   :  { %v88_v14 = vadd.f32 %v87_v13, %v39_v10 }
  0x8a   :  { %v104_v21 = vsel %vm350_vm3, %v65_v19, %v39_v10 }
  0x8b   :  { %v105_v17 = vsel %vm343_vm1, %v88_v14, %v39_v10  ;;  %v107_v22 = vsel %vm106_vm2, %v104_v21, -inf }
  0x8c   :  { %v110_v18 = vsel %vm106_vm2, %v105_v17, -inf }
  0x8d   :  { %111 = vmax.xlane.f32.xlu1 %v110_v18 }
  0x95   :  { %108 = vmax.xlane.f32.xlu1 %v107_v22 }
 0x100   :  { %v112_v23 = vpop.xlane.xlu1 %111 }
 0x101   :  { %v114_v24 = vsub.f32 %v105_v17, %v112_v23 }
 0x103   :  { %v117_v25 = vmul.f32 1.442695, %v114_v24 }
 0x105   :  { %241 = vpow2.f32 %v117_v25 }
 0x108   :  { %v109_v26 = vpop.xlane.xlu1 %108 }
 0x109   :  { %v113_v27 = vsub.f32 %v104_v21, %v109_v26 }
 0x10b   :  { %v242_v28 = vpop.eup %241  ;;  %v115_v29 = vmul.f32 1.442695, %v113_v27 }
 0x10c   :  { %v122_v30 = vsel %vm106_vm2, %v242_v28, 0.0 }
 0x10d   :  { %243 = vpow2.f32 %v115_v29  ;;  %123 = vadd.xlane.f32.xlu2 %v122_v30 }
 0x113   :  { %v244_v31 = vpop.eup %243 }
 0x114   :  { %v119_v32 = vsel %vm106_vm2, %v244_v31, 0.0 }
 0x115   :  { %120 = vadd.xlane.f32.xlu2 %v119_v32 }
 0x180   :  { %v124_v33 = vpop.xlane.xlu2 %123 }
 0x181   :  { %245 = vrcp.f32 %v124_v33  ;;  %v151_v38 = vand.u32 2147483648, %v124_v33  ;;  %v149_v40 = vand.u32 2147483647, %v124_v33  ;;  %vm145_vm5 = vweird.f32 %v124_v33 }
 0x183   :  { %v152_v43 = vor.u32 1.1754944e-38, %v151_v38  ;;  %vm150_vm7 = vcmp.eq.f32.partialorder %v149_v40, 8.507059e+37 }
 0x187   :  { %v246_v34 = vpop.eup %245 }
 0x188   :  { %v141_v35 = vmul.f32 %v246_v34, %v124_v33  ;;  %v121_v36 = vpop.xlane.xlu2 %120  ;;  %vm146_vm4 = vweird.f32 %v246_v34 }
 0x189   :  { %247 = vrcp.f32 %v121_v36  ;;  %vm147_vm6 = vmor %vm145_vm5, %vm146_vm4  ;;  %v136_v49 = vand.u32 2147483648, %v121_v36  ;;  %v134_v51 = vand.u32 2147483647, %v121_v36  ;;  %vm130_vm10 = vweird.f32 %v121_v36 }
 0x18a   :  { %v142_v37 = vsub.f32 1.0, %v141_v35 }
 0x18b   :  { %v137_v54 = vor.u32 1.1754944e-38, %v136_v49  ;;  %vm135_vm12 = vcmp.eq.f32.partialorder %v134_v51, 8.507059e+37 }
 0x18c   :  { %v143_v39 = vmul.f32 %v246_v34, %v142_v37 }
 0x18e   :  { %v144_v41 = vadd.f32 %v246_v34, %v143_v39 }
 0x18f   :  { %v248_v42 = vpop.eup %247 }
 0x190   :  { %v126_v44 = vmul.f32 %v248_v42, %v121_v36  ;;  %v148_v45 = vsel %vm147_vm6, %v246_v34, %v144_v41  ;;  %vm131_vm9 = vweird.f32 %v248_v42 }
 0x191   :  { %v153_v46 = vsel %vm150_vm7, %v152_v43, %v148_v45  ;;  %vm132_vm11 = vmor %vm130_vm10, %vm131_vm9 }
 0x192   :  { %v127_v47 = vsub.f32 1.0, %v126_v44  ;;  %v154_v48 = vmul.f32 %v242_v28, %v153_v46 }
 0x194   :  { %v128_v50 = vmul.f32 %v248_v42, %v127_v47  ;;  %v156_v52 = vsel %vm343_vm1, %v154_v48, 0.0 }
 0x195   :  { %234 = vmatmul.msk.f32.vlgmr.msra.gmra.mxu3 %vm157_vm8, %v156_v52 }
 0x196   :  { %v129_v53 = vadd.f32 %v248_v42, %v128_v50 }
 0x198   :  { %v133_v55 = vsel %vm132_vm11, %v248_v42, %v129_v53 }
 0x199   :  { %v138_v56 = vsel %vm135_vm12, %v137_v54, %v133_v55 }
 0x19a   :  { %v139_v57 = vmul.f32 %v244_v31, %v138_v56 }
 0x19c   :  { %v155_v58 = vsel %vm350_vm3, %v139_v57, 0.0 }
 0x19d   :  { %233 = vmatmul.msk.f32.vlgmr.msra.gmra.mxu2 %vm157_vm8, %v155_v58 }
 0x218   :  { %v201_v59 = vpop.f32.mrf.mxu3 }
 0x219   :  { %v206_v60 = vrot.slane %v201_v59, 7 }
 0x220   :  { %v178_v61 = vpop.f32.mrf.mxu2 }
 0x221   :  { %v208_v62 = vsel %vm207_vm13, %v206_v60, %v178_v61 }
 0x222   :  { %211 = vst.msk [vmem:[#allocation6] sm:$0x3] %vm210_vm14, %v208_v62 }
 0x223   :  { %222 = dma.vmem_to_hbm [thread:$0]  %s218_s2, 32, %s220_s28, [#allocation5]  }
 0x224   :  { %299 = dma.done.wait [#allocation5], 32  }
 0x225   :  { %300 = vsyncadd [#allocation5], 4294967264 }
 0x226   :  { %227 = vsyncpa [#allocation4], 1 }
 0x227   :  { %228 = vsyncpa [#allocation5], 1 }

</bundles_post_ra>
